<compile_context>
chip_gen: v5e
topology: v5e:2x2
jax: 0.10.0
libtpu: 0.0.40
codegen_flags: <defaults>
</compile_context>

<pallas_src>
import functools

import jax
import jax.numpy as jnp
from jax import lax
from jax.experimental import pallas as pl
from jax.experimental.pallas import tpu as pltpu


# --------------------------------------------------------------------------- #
# Kernels
# --------------------------------------------------------------------------- #
def _tap_stack_gemm_kernel(w_ref, b_ref, x_ref, o_ref, stk_ref, *,
                           KH, KW, Cin, Wout, TM):
    # w_ref:   (Cout, K)          bf16   K = KH*KW*Cin
    # b_ref:   (Cout, 1)          f32
    # x_ref:   (KW*Cin, HB*Wout)  bf16   halo'd row block, HB = th + KH - 1
    # o_ref:   (Cout, TM)         f32    TM = th*Wout (lane-dense)
    # stk_ref: (K, TM)            bf16   VMEM tap stack (in-VMEM im2col)
    for kh in range(KH):
        off = kh * Wout
        for kw in range(KW):
            t = kh * KW + kw
            stk_ref[t * Cin:(t + 1) * Cin, :] = (
                x_ref[kw * Cin:(kw + 1) * Cin, off:off + TM])
    acc = jnp.dot(w_ref[...], stk_ref[...], preferred_element_type=jnp.float32)
    o_ref[...] = (acc + b_ref[...]).astype(o_ref.dtype)


def _gemm_bias_kernel(w_ref, b_ref, x_ref, o_ref):
    # Fallback: plain fused GEMM on a pre-stacked (K, tm) im2col tile.
    acc = jnp.dot(w_ref[...], x_ref[...], preferred_element_type=jnp.float32)
    o_ref[...] = (acc + b_ref[...]).astype(o_ref.dtype)


# --------------------------------------------------------------------------- #
# Tiling helpers
# --------------------------------------------------------------------------- #
def _compute_padding(size, k, s):
    # identical to CircularConv2d._compute_padding
    if size % s == 0:
        pad = max(k - s, 0)
    else:
        pad = max(k - size % s, 0)
    pad_top = pad // 2
    return (pad_top, pad - pad_top)


def _vmem_budget_bytes():
    """Generation-aware (budget, vmem_limit). Conservative v7x (64 MiB) default."""
    budget, limit = 20 << 20, 48 << 20
    try:
        cap = pltpu.get_tpu_info().vmem_capacity_bytes
        if cap >= (100 << 20):          # v5e / v6e: 128 MiB physical VMEM
            budget, limit = 40 << 20, 96 << 20
    except Exception:
        pass
    return budget, limit


def _choose_fast_rows(N, Hout, Wout, KH, KW, Cin, Cout, budget):
    """Largest row tile th | Hout with lane-dense th*Wout that fits VMEM."""
    K = KH * KW * Cin
    w_bytes = 2 * Cout * K * 2                                  # resident weights (2 bufs)
    cands = [d for d in range(Hout, 0, -1)
             if Hout % d == 0 and (d == Hout or (d * Wout) % 128 == 0)]
    fitting = []
    for th in cands:
        TM = th * Wout
        HB = th + KH - 1
        need = (2 * KW * Cin * HB * Wout * 2        # halo input block, double-buffered
                + 2 * Cout * TM * 4                 # f32 output block, double-buffered
                + K * TM * 2                        # VMEM tap stack (scratch)
                + w_bytes + (256 << 10))
        if need <= budget:
            fitting.append(th)
    if not fitting:
        return None
    th = fitting[0]
    if N * (Hout // th) < 2:                        # keep both v7x TensorCores busy
        for cand in fitting:
            if N * (Hout // cand) >= 2:
                th = cand
                break
    return th


def _choose_gemm_cols(N, HW, K, Cout, budget):
    """Largest lane-aligned column tile for the fallback GEMM path."""
    w_bytes = 2 * Cout * K * 2
    cands = [HW] + [c for c in (32768, 16384, 8192, 4096, 2048, 1024, 512, 256, 128)
                    if c < HW]
    fitting = [c for c in cands
               if w_bytes + 2 * c * (K * 2 + Cout * 4) + (256 << 10) <= budget]
    if not fitting:
        fitting = [128]
    tm = fitting[0]
    if N * ((HW + tm - 1) // tm) < 2:
        for c in fitting:
            if N * ((HW + c - 1) // c) >= 2:
                tm = c
                break
    return tm


# --------------------------------------------------------------------------- #
# Forward pass
# --------------------------------------------------------------------------- #
def _circular_conv2d_impl(x_nchw, weight, bias, *, stride=(1, 1),
                          compute_dtype=jnp.bfloat16):
    """x_nchw: (N, Cin, H, W); weight: (Cout, Cin, KH, KW); bias: (Cout,)."""
    N, Cin, H, W = x_nchw.shape
    Cout, _, KH, KW = weight.shape
    sh, sw = stride
    ph = _compute_padding(H, KH, sh)
    pw = _compute_padding(W, KW, sw)
    if ph[0] + ph[1] > H or pw[0] + pw[1] > W:
        # torch 'circular' padding requires pad <= input dim
        raise ValueError("circular padding larger than the input is unsupported")

    out_dtype = x_nchw.dtype
    # bf16 cast BEFORE pad / tap extraction (halves wrapper HBM traffic).
    xc = x_nchw.astype(compute_dtype)
    xp = jnp.pad(xc, ((0, 0), (0, 0), ph, pw), mode="wrap")      # (N, Cin, Hp, Wp)
    Hp, Wp = xp.shape[2], xp.shape[3]
    Hout = (Hp - KH) // sh + 1
    Wout = (Wp - KW) // sw + 1
    K = KH * KW * Cin
    HW = Hout * Wout

    # w2d[co, (kh*KW+kw)*Cin + c] = weight[co, c, kh, kw]
    w2d = jnp.transpose(weight, (0, 2, 3, 1)).reshape(Cout, K).astype(compute_dtype)
    b2d = bias.reshape(Cout, 1).astype(jnp.float32)

    budget, vmem_limit = _vmem_budget_bytes()
    cparams = pltpu.CompilerParams(dimension_semantics=("parallel", "arbitrary"),
                                   vmem_limit_bytes=vmem_limit)

    th = _choose_fast_rows(N, Hout, Wout, KH, KW, Cin, Cout, budget) if sh == 1 else None

    if th is not None:
        # ------------------- fast path: halo'd row blocks ------------------- #
        # Wrapper duplicates the input only KW-fold (W taps); the KH row taps
        # are sliced in-kernel from a flattened VMEM halo block.
        R = Hout // th
        HB = th + KH - 1
        TM = th * Wout
        blocks = []
        for r in range(R):
            cols = [xp[:, :, r * th:r * th + HB, kw:kw + Wout * sw:sw]   # (N,Cin,HB,Wout)
                    for kw in range(KW)]
            blocks.append(jnp.concatenate(cols, axis=1).reshape(N, KW * Cin, HB * Wout))
        xt = jnp.stack(blocks, axis=1)                    # (N, R, KW*Cin, HB*Wout) bf16

        kernel = functools.partial(_tap_stack_gemm_kernel,
                                   KH=KH, KW=KW, Cin=Cin, Wout=Wout, TM=TM)
        out_flat = pl.pallas_call(
            kernel,
            out_shape=jax.ShapeDtypeStruct((N, Cout, HW), out_dtype),
            grid_spec=pltpu.PrefetchScalarGridSpec(
                num_scalar_prefetch=0,
                grid=(N, R),
                in_specs=[
                    pl.BlockSpec((Cout, K), lambda n, r: (0, 0)),           # weights
                    pl.BlockSpec((Cout, 1), lambda n, r: (0, 0)),           # bias
                    pl.BlockSpec((None, None, KW * Cin, HB * Wout),
                                 lambda n, r: (n, r, 0, 0)),                # halo block
                ],
                out_specs=pl.BlockSpec((None, Cout, TM), lambda n, r: (n, 0, r)),
                scratch_shapes=[pltpu.VMEM((K, TM), compute_dtype)],
            ),
            compiler_params=cparams,
        )(w2d, b2d, xt)
    else:
        # --------------- fallback: per-image im2col fused GEMM -------------- #
        # (strided rows, or shapes whose halo tiles do not fit the VMEM budget)
        taps = []
        for kh in range(KH):
            for kw in range(KW):
                v = xp[:, :, kh:kh + Hout * sh:sh, kw:kw + Wout * sw:sw]  # (N,Cin,Hout,Wout)
                taps.append(v.reshape(N, Cin, HW))
        x2d = jnp.concatenate(taps, axis=1)                               # (N, K, HW) bf16

        tm = _choose_gemm_cols(N, HW, K, Cout, budget)
        num_tiles = (HW + tm - 1) // tm                 # ragged tail handled by Pallas
        out_flat = pl.pallas_call(
            _gemm_bias_kernel,
            out_shape=jax.ShapeDtypeStruct((N, Cout, HW), out_dtype),
            grid_spec=pltpu.PrefetchScalarGridSpec(
                num_scalar_prefetch=0,
                grid=(N, num_tiles),
                in_specs=[
                    pl.BlockSpec((Cout, K), lambda n, j: (0, 0)),
                    pl.BlockSpec((Cout, 1), lambda n, j: (0, 0)),
                    pl.BlockSpec((None, K, tm), lambda n, j: (n, 0, j)),
                ],
                out_specs=pl.BlockSpec((None, Cout, tm), lambda n, j: (n, 0, j)),
            ),
            compiler_params=cparams,
        )(w2d, b2d, x2d)

    # (N, Cout, Hout*Wout) -> (N, Cout, Hout, Wout): metadata-only reshape.
    return out_flat.reshape(N, Cout, Hout, Wout)


circular_conv2d = jax.jit(_circular_conv2d_impl,
                          static_argnames=("stride", "compute_dtype"))


def _reference(x_nchw, weight, bias, stride):
    """Pure-JAX f32 reference (circular pad + VALID conv), for checking only."""
    N, Cin, H, W = x_nchw.shape
    Cout, _, KH, KW = weight.shape
    sh, sw = stride
    ph = _compute_padding(H, KH, sh)
    pw = _compute_padding(W, KW, sw)
    xp = jnp.pad(x_nchw, ((0, 0), (0, 0), ph, pw), mode="wrap")
    out = lax.conv_general_dilated(
        xp, weight, window_strides=(sh, sw), padding="VALID",
        dimension_numbers=("NCHW", "OIHW", "NCHW"))
    return out + bias.reshape(1, Cout, 1, 1)


if __name__ == "__main__":
    key = jax.random.PRNGKey(0)
    k1, k2, k3 = jax.random.split(key, 3)

    # small shapes consistent with the module: NCHW input, 3x3 kernel
    N, Cin, H, W = 2, 4, 16, 16
    Cout, Ksz = 8, 3

    x = jax.random.normal(k1, (N, Cin, H, W), dtype=jnp.float32)

    # deterministic parameter init (PyTorch Conv2d-style uniform bounds)
    fan_in = Cin * Ksz * Ksz
    bound = 1.0 / (fan_in ** 0.5)
    weight = jax.random.uniform(k2, (Cout, Cin, Ksz, Ksz), jnp.float32, -bound, bound)
    bias = jax.random.uniform(k3, (Cout,), jnp.float32, -bound, bound)

    # stride-1 default path (halo'd row-block kernel)
    out = jax.block_until_ready(circular_conv2d(x, weight, bias, stride=(1, 1)))
    ref = _reference(x, weight, bias, (1, 1))
    assert out.shape == (N, Cout, H, W), out.shape
    assert jnp.allclose(out, ref, rtol=3e-2, atol=3e-2), \
        float(jnp.max(jnp.abs(out - ref)))

    # strided case exercises the im2col fallback kernel
    out2 = jax.block_until_ready(circular_conv2d(x, weight, bias, stride=(2, 2)))
    ref2 = _reference(x, weight, bias, (2, 2))
    assert out2.shape == ref2.shape, (out2.shape, ref2.shape)
    assert jnp.allclose(out2, ref2, rtol=3e-2, atol=3e-2), \
        float(jnp.max(jnp.abs(out2 - ref2)))

    print("KERNEL_OK")
</pallas_src>

<mosaic_0001>
module attributes {stable_mosaic.version = 11 : i64} {
  func.func @_tap_stack_gemm_kernel(%arg0: i32, %arg1: i32, %arg2: memref<8x36xbf16, #tpu.memory_space<vmem>>, %arg3: memref<8x1xf32, #tpu.memory_space<vmem>>, %arg4: memref<1x1x12x288xbf16, #tpu.memory_space<vmem>>, %arg5: memref<1x8x256xf32, #tpu.memory_space<vmem>>, %arg6: memref<36x256xbf16, #tpu.memory_space<vmem>>) attributes {dimension_semantics = [#tpu.dimension_semantics<parallel>, #tpu.dimension_semantics<arbitrary>], iteration_bounds = array<i64: 2, 1>, scalar_prefetch = 0 : i64, scratch_operands = 1 : i64, tpu.core_type = #tpu.core_type<tc>, window_params = [{pipeline_mode = #tpu.pipeline_mode<synchronous>, transform_indices = @transform_0, window_bounds = array<i64: 8, 36>}, {pipeline_mode = #tpu.pipeline_mode<synchronous>, transform_indices = @transform_1, window_bounds = array<i64: 8, 1>}, {transform_indices = @transform_2, window_bounds = array<i64: 1, 1, 12, 288>}, {transform_indices = @transform_3, window_bounds = array<i64: 1, 8, 256>}]} {
    %c0 = arith.constant 0 : index
    %c0_0 = arith.constant 0 : index
    %c0_1 = arith.constant 0 : index
    %c0_2 = arith.constant 0 : index
    %0 = vector.load %arg4[%c0, %c0_0, %c0_1, %c0_2] : memref<1x1x12x288xbf16, #tpu.memory_space<vmem>>, vector<1x1x4x256xbf16>
    %1 = vector.shape_cast %0 : vector<1x1x4x256xbf16> to vector<4x256xbf16>
    %c0_3 = arith.constant 0 : index
    %c0_4 = arith.constant 0 : index
    %2 = vector.load %arg6[%c0_3, %c0_4] : memref<36x256xbf16, #tpu.memory_space<vmem>>, vector<4x256xbf16>
    tpu.vector_store %arg6[%c0_3, %c0_4], %1 {strides = array<i32>} : memref<36x256xbf16, #tpu.memory_space<vmem>>, vector<4x256xbf16>,
    %c0_5 = arith.constant 0 : index
    %c0_6 = arith.constant 0 : index
    %c4 = arith.constant 4 : index
    %c0_7 = arith.constant 0 : index
    %3 = vector.load %arg4[%c0_5, %c0_6, %c4, %c0_7] : memref<1x1x12x288xbf16, #tpu.memory_space<vmem>>, vector<1x1x4x256xbf16>
    %4 = vector.shape_cast %3 : vector<1x1x4x256xbf16> to vector<4x256xbf16>
    %c4_8 = arith.constant 4 : index
    %c0_9 = arith.constant 0 : index
    %5 = vector.load %arg6[%c4_8, %c0_9] : memref<36x256xbf16, #tpu.memory_space<vmem>>, vector<4x256xbf16>
    tpu.vector_store %arg6[%c4_8, %c0_9], %4 {strides = array<i32>} : memref<36x256xbf16, #tpu.memory_space<vmem>>, vector<4x256xbf16>,
    %c0_10 = arith.constant 0 : index
    %c0_11 = arith.constant 0 : index
    %c8 = arith.constant 8 : index
    %c0_12 = arith.constant 0 : index
    %6 = vector.load %arg4[%c0_10, %c0_11, %c8, %c0_12] : memref<1x1x12x288xbf16, #tpu.memory_space<vmem>>, vector<1x1x4x256xbf16>
    %7 = vector.shape_cast %6 : vector<1x1x4x256xbf16> to vector<4x256xbf16>
    %c8_13 = arith.constant 8 : index
    %c0_14 = arith.constant 0 : index
    %8 = vector.load %arg6[%c8_13, %c0_14] : memref<36x256xbf16, #tpu.memory_space<vmem>>, vector<4x256xbf16>
    tpu.vector_store %arg6[%c8_13, %c0_14], %7 {strides = array<i32>} : memref<36x256xbf16, #tpu.memory_space<vmem>>, vector<4x256xbf16>,
    %c0_15 = arith.constant 0 : index
    %c0_16 = arith.constant 0 : index
    %c0_17 = arith.constant 0 : index
    %c16 = arith.constant 16 : index
    %9 = vector.load %arg4[%c0_15, %c0_16, %c0_17, %c16] : memref<1x1x12x288xbf16, #tpu.memory_space<vmem>>, vector<1x1x4x256xbf16>
    %10 = vector.shape_cast %9 : vector<1x1x4x256xbf16> to vector<4x256xbf16>
    %c12 = arith.constant 12 : index
    %c0_18 = arith.constant 0 : index
    %11 = vector.load %arg6[%c12, %c0_18] : memref<36x256xbf16, #tpu.memory_space<vmem>>, vector<4x256xbf16>
    tpu.vector_store %arg6[%c12, %c0_18], %10 {strides = array<i32>} : memref<36x256xbf16, #tpu.memory_space<vmem>>, vector<4x256xbf16>,
    %c0_19 = arith.constant 0 : index
    %c0_20 = arith.constant 0 : index
    %c4_21 = arith.constant 4 : index
    %c16_22 = arith.constant 16 : index
    %12 = vector.load %arg4[%c0_19, %c0_20, %c4_21, %c16_22] : memref<1x1x12x288xbf16, #tpu.memory_space<vmem>>, vector<1x1x4x256xbf16>
    %13 = vector.shape_cast %12 : vector<1x1x4x256xbf16> to vector<4x256xbf16>
    %c16_23 = arith.constant 16 : index
    %c0_24 = arith.constant 0 : index
    %14 = vector.load %arg6[%c16_23, %c0_24] : memref<36x256xbf16, #tpu.memory_space<vmem>>, vector<4x256xbf16>
    tpu.vector_store %arg6[%c16_23, %c0_24], %13 {strides = array<i32>} : memref<36x256xbf16, #tpu.memory_space<vmem>>, vector<4x256xbf16>,
    %c0_25 = arith.constant 0 : index
    %c0_26 = arith.constant 0 : index
    %c8_27 = arith.constant 8 : index
    %c16_28 = arith.constant 16 : index
    %15 = vector.load %arg4[%c0_25, %c0_26, %c8_27, %c16_28] : memref<1x1x12x288xbf16, #tpu.memory_space<vmem>>, vector<1x1x4x256xbf16>
    %16 = vector.shape_cast %15 : vector<1x1x4x256xbf16> to vector<4x256xbf16>
    %c20 = arith.constant 20 : index
    %c0_29 = arith.constant 0 : index
    %17 = vector.load %arg6[%c20, %c0_29] : memref<36x256xbf16, #tpu.memory_space<vmem>>, vector<4x256xbf16>
    tpu.vector_store %arg6[%c20, %c0_29], %16 {strides = array<i32>} : memref<36x256xbf16, #tpu.memory_space<vmem>>, vector<4x256xbf16>,
    %c0_30 = arith.constant 0 : index
    %c0_31 = arith.constant 0 : index
    %c0_32 = arith.constant 0 : index
    %c32 = arith.constant 32 : index
    %18 = vector.load %arg4[%c0_30, %c0_31, %c0_32, %c32] : memref<1x1x12x288xbf16, #tpu.memory_space<vmem>>, vector<1x1x4x256xbf16>
    %19 = vector.shape_cast %18 : vector<1x1x4x256xbf16> to vector<4x256xbf16>
    %c24 = arith.constant 24 : index
    %c0_33 = arith.constant 0 : index
    %20 = vector.load %arg6[%c24, %c0_33] : memref<36x256xbf16, #tpu.memory_space<vmem>>, vector<4x256xbf16>
    tpu.vector_store %arg6[%c24, %c0_33], %19 {strides = array<i32>} : memref<36x256xbf16, #tpu.memory_space<vmem>>, vector<4x256xbf16>,
    %c0_34 = arith.constant 0 : index
    %c0_35 = arith.constant 0 : index
    %c4_36 = arith.constant 4 : index
    %c32_37 = arith.constant 32 : index
    %21 = vector.load %arg4[%c0_34, %c0_35, %c4_36, %c32_37] : memref<1x1x12x288xbf16, #tpu.memory_space<vmem>>, vector<1x1x4x256xbf16>
    %22 = vector.shape_cast %21 : vector<1x1x4x256xbf16> to vector<4x256xbf16>
    %c28 = arith.constant 28 : index
    %c0_38 = arith.constant 0 : index
    %23 = vector.load %arg6[%c28, %c0_38] : memref<36x256xbf16, #tpu.memory_space<vmem>>, vector<4x256xbf16>
    tpu.vector_store %arg6[%c28, %c0_38], %22 {strides = array<i32>} : memref<36x256xbf16, #tpu.memory_space<vmem>>, vector<4x256xbf16>,
    %c0_39 = arith.constant 0 : index
    %c0_40 = arith.constant 0 : index
    %c8_41 = arith.constant 8 : index
    %c32_42 = arith.constant 32 : index
    %24 = vector.load %arg4[%c0_39, %c0_40, %c8_41, %c32_42] : memref<1x1x12x288xbf16, #tpu.memory_space<vmem>>, vector<1x1x4x256xbf16>
    %25 = vector.shape_cast %24 : vector<1x1x4x256xbf16> to vector<4x256xbf16>
    %c32_43 = arith.constant 32 : index
    %c0_44 = arith.constant 0 : index
    %26 = vector.load %arg6[%c32_43, %c0_44] : memref<36x256xbf16, #tpu.memory_space<vmem>>, vector<4x256xbf16>
    tpu.vector_store %arg6[%c32_43, %c0_44], %25 {strides = array<i32>} : memref<36x256xbf16, #tpu.memory_space<vmem>>, vector<4x256xbf16>,
    %c0_45 = arith.constant 0 : index
    %c0_46 = arith.constant 0 : index
    %27 = vector.load %arg2[%c0_45, %c0_46] : memref<8x36xbf16, #tpu.memory_space<vmem>>, vector<8x36xbf16>
    %c0_47 = arith.constant 0 : index
    %c0_48 = arith.constant 0 : index
    %28 = vector.load %arg6[%c0_47, %c0_48] : memref<36x256xbf16, #tpu.memory_space<vmem>>, vector<36x256xbf16>
    %cst = arith.constant dense<0.000000e+00> : vector<8x256xf32>
    %29 = tpu.matmul %27, %28, %cst {dimension_numbers = #tpu.dot_dimension_numbers<[1], [0], [0], [1], [0, 0, 1, 1], [], []>} : vector<8x36xbf16>, vector<36x256xbf16>, vector<8x256xf32> -> vector<8x256xf32>
    %c0_49 = arith.constant 0 : index
    %c0_50 = arith.constant 0 : index
    %30 = vector.load %arg3[%c0_49, %c0_50] : memref<8x1xf32, #tpu.memory_space<vmem>>, vector<8x1xf32>
    %31 = vector.broadcast %30 : vector<8x1xf32> to vector<8x256xf32>
    %32 = arith.addf %29, %31 : vector<8x256xf32>
    %c0_51 = arith.constant 0 : index
    %c0_52 = arith.constant 0 : index
    %c0_53 = arith.constant 0 : index
    %33 = vector.load %arg5[%c0_51, %c0_52, %c0_53] : memref<1x8x256xf32, #tpu.memory_space<vmem>>, vector<1x8x256xf32>
    %34 = vector.shape_cast %33 : vector<1x8x256xf32> to vector<8x256xf32>
    %35 = vector.shape_cast %32 : vector<8x256xf32> to vector<1x8x256xf32>
    tpu.vector_store %arg5[%c0_51, %c0_52, %c0_53], %35 {strides = array<i32>} : memref<1x8x256xf32, #tpu.memory_space<vmem>>, vector<1x8x256xf32>,
    return
  }
  func.func @transform_0(%arg0: i32, %arg1: i32) -> (i32, i32) {
    %c0_i32 = arith.constant 0 : i32
    %c0_i32_0 = arith.constant 0 : i32
    %c0_i32_1 = arith.constant 0 : i32
    return %c0_i32, %c0_i32_0 : i32, i32
  }
  func.func @transform_1(%arg0: i32, %arg1: i32) -> (i32, i32) {
    %c0_i32 = arith.constant 0 : i32
    %c0_i32_0 = arith.constant 0 : i32
    %c0_i32_1 = arith.constant 0 : i32
    return %c0_i32, %c0_i32_0 : i32, i32
  }
  func.func @transform_2(%arg0: i32, %arg1: i32) -> (i32, i32, i32, i32) {
    %c0_i32 = arith.constant 0 : i32
    %c0_i32_0 = arith.constant 0 : i32
    %c0_i32_1 = arith.constant 0 : i32
    return %arg0, %arg1, %c0_i32, %c0_i32_0 : i32, i32, i32, i32
  }
  func.func @transform_3(%arg0: i32, %arg1: i32) -> (i32, i32, i32) {
    %c0_i32 = arith.constant 0 : i32
    %c0_i32_0 = arith.constant 0 : i32
    return %arg0, %c0_i32, %arg1 : i32, i32, i32
  }
}

</mosaic_0001>

<bundles_post_ra>
// kernel: _circular_conv2d_impl.1
= control target key start
LH: loop header
LB: loop body
LE: loop exit
PB: predicated region body
PF: predicated region fallthrough
CT: control target
= control target key end

     0   :  { %s587_s12 = smov 0   ;;  %s589_s13 = smov 0   ;;  %s659_s0 = inlined_call_operand.vmem [shape: bf16[8,36], index: 0, kind: input, shape index: {}]   ;;  %s660_s1 = inlined_call_operand.vmem [shape: f32[8,1], index: 1, kind: input, shape index: {}]   ;;  %s661_s2 = inlined_call_operand.vmem [shape: bf16[2,1,12,288], index: 2, kind: input, shape index: {}]   ;;  %s662_s3 = inlined_call_operand.vmem [shape: f32[2,8,256], index: 3, kind: output, shape index: {}]  }
   0x1   :  { %s591_s14 = smov 0  }
   0x2 LB: > { %s25_s15 = sadd.s32 1, %s558_s13  ;;  %p480_p0 = scmp.ge.s32.totalorder %s562_s14, 1  ;;  %s562_s14 = sphi %s591_s14, %s13_s14   ;;  %s558_s13 = sphi %s589_s13, %s664_s13   ;;  %s554_s12 = sphi %s587_s12, %s663_s12  }
   0x3   : > { %p27_p1 = scmp.ge.s32.totalorder %s25_s15, 2  ;;  %p157_p2 = scmp.lt.s32.totalorder %s562_s14, 3 }
   0x5   : > { %s666_s15 = smov (%p27_p1, %s25_s15), 0  ;;  %p158_p3 = pnand %p480_p0, %p157_p2 }
   0x6   : > { %p189_p4 = scmp.lt.s32.totalorder (!%p158_p3), %s554_s12, 1  ;;  %s564_s20 = smov (!%p158_p3), 96  }
   0x7   : > { %161 = sbr.rel (%p158_p3) target bundleno = 311 (0x137), region = 32  ;;  %s565_s21 = smov (!%p158_p3), 112  }
   0xc   : > { %s668_s12 = smov (!%p189_p4, %s554_s12), 1  ;;  %vm227_vm0 = vcmask 1043456   ;;  %vm229_vm1 = vcmask 916480   ;;  %vm278_vm2 = vcmask 785408   ;;  %v316_v40 = vld [vmem:[%s660_s1] sm:$0xff]  ;;  %v566_v41 = vmov 0  }
   0xd   : > { %s511_s16 = smul.u32 24, %s668_s12  ;;  %539 = vset.pattern.permute.xlu0 %v566_v41  ;;  %vm351_vm3 = vcmask 1041408   ;;  %vm347_vm4 = vcmask 293888   ;;  %s506_s26 = sshll.u32 %s668_s12, 4 }
   0xe   : > { %s206_s29 = scalar_lea.vmem %s662_s3, %s506_s26 }
   0xf   : > { %s611_s19 = scalar_lea.vmem %s661_s2, %s511_s16 }
  0x10   : > { %v296_v0 = vld [vmem:[%s611_s19 + $0xc] sm:$0x33]  ;;  %v233_v1 = vld [vmem:[%s611_s19] sm:$0xcc]  ;;  %v234_v5 = vld [vmem:[%s611_s19 + $0x8] sm:$0xc] }
  0x11   : > { %300 = vrot.lane.b32.xlu0 %v296_v0, %s564_s20  ;;  %v484_v2 = vrot.slane %v233_v1, 10  ;;  %v251_v3 = vld [vmem:[%s611_s19 + $0xc] sm:$0x33]  ;;  %v297_v6 = vld [vmem:[%s611_s19 + $0x14] sm:$0x3]  ;;  %v485_v8 = vrot.slane %v234_v5, 10 }
  0x12   : > { %v255_v4 = vrot.slane %v251_v3, 6  ;;  %v252_v7 = vld [vmem:[%s611_s19 + $0x14] sm:$0x3]  ;;  %v267_v10 = vld [vmem:[%s611_s19] sm:$0x33] }
  0x13   : > { %241 = vrot.lane.b32.xlu1 %v484_v2, %s565_s21  ;;  %v256_v9 = vrot.slane %v252_v7, 6  ;;  %v268_v11 = vld [vmem:[%s611_s19 + $0x8] sm:$0x3]  ;;  %v282_v12 = vld [vmem:[%s611_s19] sm:$0xcc] }
  0x14   : > { %257 = vrot.lane.b32.xlu2 %v255_v4, %s565_s21  ;;  %v215_v13 = vld [vmem:[%s611_s19] sm:$0x33]  ;;  %v283_v14 = vld [vmem:[%s611_s19 + $0x8] sm:$0xc]  ;;  %v216_v15 = vld [vmem:[%s611_s19 + $0x8] sm:$0x3] }
  0x15   : > { %v219_v16 = vrot.slane %v215_v13, 6  ;;  %v220_v17 = vrot.slane %v216_v15, 6  ;;  %v209_v24 = vld [vmem:[%s611_s19] sm:$0x33]  ;;  %v211_v25 = vld [vmem:[%s611_s19] sm:$0xcc] }
  0x16   : > { %v213_v26 = vld [vmem:[%s611_s19 + $0xc] sm:$0x33]  ;;  %210 = vst [vmem:[#allocation2] sm:$0x33] %v209_v24 }
  0x17   : > { %212 = vst [vmem:[#allocation2] sm:$0xcc] %v211_v25 }
  0x18   : > { %214 = vst [vmem:[#allocation2 + $0x8] sm:$0x33] %v213_v26 }
  0x19   : > { %302 = vrot.lane.b32.xlu0 %v297_v6, %s564_s20 }
  0x1b   : > { %243 = vrot.lane.b32.xlu1 %v485_v8, %s565_s21 }
  0x1c   : > { %259 = vrot.lane.b32.xlu2 %v256_v9, %s565_s21 }
  0x1e   : > { %v488_v8 = vld [vmem:[#allocation2] sm:$0xf] }
  0x21   : > { %271 = vrot.lane.b32.xlu0 %v267_v10, %s564_s20  ;;  %v507_v10 = vld [vmem:[#allocation2 + $0x4] sm:$0xf] }
  0x23   : > { %273 = vrot.lane.b32.xlu1 %v268_v11, %s564_s20 }
  0x24   : > { %286 = vrot.lane.b32.xlu2 %v282_v12, %s564_s20 }
  0x29   : > { %288 = vrot.lane.b32.xlu0 %v283_v14, %s564_s20  ;;  %v310_v14 = vld [vmem:[%s659_s0] sm:$0xf] }
  0x2b   : > { %221 = vrot.lane.b32.xlu1 %v219_v16, %s565_s21 }
  0x2c   : > { %223 = vrot.lane.b32.xlu2 %v220_v17, %s565_s21 }
  0x31   : > { %319 = vperm.xlu0 %539, %v316_v40  }
  0x6e   : > { %v258_v18 = vpop.permute.xlu2 %257 }
  0x6f   : > { %v261_v19 = vrot.slane %v258_v18, 4 }
  0x76   : > { %v260_v20 = vpop.permute.xlu2 %259 }
  0x77   : > { %v262_v21 = vrot.slane %v260_v20, 4 }
  0x79   : > { %v263_v22 = vsel %vm227_vm0, %v261_v19, %v262_v21 }
  0x7a   : > { %v264_v23 = vsel %vm229_vm1, %v258_v18, %v263_v22 }
  0x7b   : > { %266 = vst [vmem:[#allocation2 + $0x10] sm:$0xcc] %v264_v23 }
  0x7e   : > { %v287_v37 = vpop.permute.xlu2 %286 }
  0x7f   : > { %v290_v54 = vrot.slane %v287_v37, 4 }
  0x83   : > { %v301_v27 = vpop.permute.xlu0 %300 }
  0x84   : > { %v304_v30 = vrot.slane %v301_v27, 4 }
  0x85   : > { %v242_v28 = vpop.permute.xlu1 %241 }
  0x86   : > { %v245_v33 = vrot.slane %v242_v28, 4  ;;  %v224_v51 = vpop.permute.xlu2 %223 }
  0x87   : > { %v226_v59 = vrot.slane %v224_v51, 4 }
  0x8b   : > { %v303_v29 = vpop.permute.xlu0 %302 }
  0x8c   : > { %v305_v31 = vrot.slane %v303_v29, 4 }
  0x8d   : > { %v244_v32 = vpop.permute.xlu1 %243 }
  0x8e   : > { %v306_v34 = vsel %vm227_vm0, %v304_v30, %v305_v31  ;;  %v246_v35 = vrot.slane %v244_v32, 4 }
  0x8f   : > { %v307_v36 = vsel %vm278_vm2, %v301_v27, %v306_v34 }
  0x90   : > { %309 = vst [vmem:[#allocation2 + $0x20] sm:$0x33] %v307_v36  ;;  %v247_v38 = vsel %vm227_vm0, %v245_v33, %v246_v35 }
  0x91   : > { %v248_v39 = vsel %vm229_vm1, %v242_v28, %v247_v38 }
  0x92   : > { %250 = vst [vmem:[#allocation2 + $0x10] sm:$0x33] %v248_v39 }
  0x93   : > { %v272_v42 = vpop.permute.xlu0 %271 }
  0x94   : > { %v275_v44 = vrot.slane %v272_v42, 4 }
  0x95   : > { %v274_v43 = vpop.permute.xlu1 %273 }
  0x96   : > { %v276_v45 = vrot.slane %v274_v43, 4 }
  0x97   : > { %v315_v46 = vld [vmem:[#allocation2 + $0x20] sm:$0x33] }
  0x98   : > { %v277_v47 = vsel %vm227_vm0, %v275_v44, %v276_v45  ;;  %v335_v48 = vunpack.c.l.b16 %v315_v46  ;;  %v336_v49 = vunpack.c.h.b16 %v315_v46 }
  0x99   : > { %v279_v50 = vsel %vm278_vm2, %v272_v42, %v277_v47  ;;  %v496_v2 = vld [vmem:[#allocation2 + $0x10] sm:$0xf]  ;;  %v509_v4 = vld [vmem:[#allocation2 + $0x14] sm:$0xf] }
  0x9a   : > { %281 = vst [vmem:[#allocation2 + $0x18] sm:$0x33] %v279_v50  ;;  %v341_v52 = vpack.c.b16 %v335_v48, %v335_v48  ;;  %v342_v53 = vpack.c.b16 %v336_v49, %v336_v49 }
  0x9b   : > { %v289_v55 = vpop.permute.xlu0 %288 }
  0x9c   : > { %v291_v56 = vrot.slane %v289_v55, 4  ;;  %v353_v57 = vsel %vm351_vm3, %v341_v52, 0  ;;  %v356_v58 = vsel %vm351_vm3, %v342_v53, 0 }
  0x9d   : > { %363 = vmatpush.bf16.msra.mxu0 %v353_v57  ;;  %376 = vmatpush.bf16.msra.mxu1 %v356_v58  ;;  %v222_v60 = vpop.permute.xlu1 %221 }
  0x9e   : > { %v292_v61 = vsel %vm227_vm0, %v290_v54, %v291_v56  ;;  %v225_v62 = vrot.slane %v222_v60, 4 }
  0x9f   : > { %v293_v63 = vsel %vm278_vm2, %v287_v37, %v292_v61 }
  0xa0   : > { %295 = vst [vmem:[#allocation2 + $0x18] sm:$0xcc] %v293_v63  ;;  %v228_v0 = vsel %vm227_vm0, %v225_v62, %v226_v59 }
  0xa1   : > { %v230_v1 = vsel %vm229_vm1, %v222_v60, %v228_v0 }
  0xa2   : > { %232 = vst [vmem:[#allocation2 + $0x8] sm:$0xcc] %v230_v1 }
  0xa3   : > { %v320_v15 = vpop.permute.xlu0 %319 }
  0xa7   : > { %v510_v3 = vld [vmem:[#allocation2 + $0x14] sm:$0xf0]  ;;  %v498_v5 = vld [vmem:[#allocation2 + $0x18] sm:$0xf0] }
  0xa8   : > { %v497_v6 = vor.u32 %v510_v3, %v496_v2  ;;  %v501_v7 = vor.u32 %v509_v4, %v498_v5 }
  0xa9   : > { %v508_v9 = vld [vmem:[#allocation2 + $0x4] sm:$0xf0]  ;;  %v490_v11 = vld [vmem:[#allocation2 + $0x8] sm:$0xf0] }
  0xaa   : > { %364 = vmatpush.bf16.msra.mxu0 %v497_v6  ;;  %377 = vmatpush.bf16.msra.mxu1 %v501_v7  ;;  %v489_v12 = vor.u32 %v508_v9, %v488_v8  ;;  %v493_v13 = vor.u32 %v507_v10, %v490_v11 }
  0xae   : > { %365 = vmatpush.bf16.msra.mxu0 %v489_v12  ;;  %378 = vmatpush.bf16.msra.mxu1 %v493_v13 }
  0xb1   : > { %502 = vmatmul.msk.bf16.vlgmr.msra.gmra.mxu0 %vm347_vm4, %v310_v14  ;;  %503 = vmatmul.msk.bf16.vlgmr.msra.gmra.mxu1 %vm347_vm4, %v310_v14 }
 0x12e   : > { %v367_v16 = vpop.f32.mrf.mxu0  ;;  %v380_v17 = vpop.f32.mrf.mxu1 }
 0x12f   : > { %v368_v18 = vadd.f32 %v367_v16, %v320_v15  ;;  %v381_v19 = vadd.f32 %v380_v17, %v320_v15 }
 0x131   : > { %384 = vst [vmem:[%s206_s29] sm:$0xff] %v368_v18 }
 0x132   : > { %385 = vst [vmem:[%s206_s29 + $0x8] sm:$0xff] %v381_v19 }
 0x136   : > { %v369_v20 = vpop.f32.mrf.mxu0  ;;  %v382_v21 = vpop.f32.mrf.mxu1 }
 0x137 PF: > { %s13_s14 = sadd.s32 1, %s562_s14   ;;  %s663_s12 = smov %s558_s13 }
 0x138   : > { %p10_p5 = scmp.ge.s32.totalorder %s13_s14, 4   ;;  %s664_s13 = smov %s666_s15 }
 0x13a   :  { %12 = sbr.rel (!%p10_p5) target bundleno = 2 (0x2), region = 62 }

</bundles_post_ra>
